<compile_context>
chip_gen: v7x
topology: tpu7x:2x2x1
jax: 0.10.0
libtpu: 0.0.40
codegen_flags: <defaults>
</compile_context>

<pallas_src>
import functools
import math

import jax
import jax.numpy as jnp
from jax.experimental import pallas as pl
from jax.experimental.pallas import tpu as pltpu


def _round_up(x, m):
    return -(-x // m) * m


def _positional_embedding(num_pos, d_model, dtype=jnp.float32):
    """Exact replica of the PositionalEmbedding buffer (first num_pos rows)."""
    position = jnp.arange(num_pos, dtype=jnp.float32)[:, None]                    # (P, 1)
    div_term = jnp.exp(
        jnp.arange(0, d_model, 2, dtype=jnp.float32) * -(math.log(10000.0) / d_model))
    pe = jnp.zeros((num_pos, d_model), dtype=jnp.float32)
    pe = pe.at[:, 0::2].set(jnp.sin(position * div_term))
    cos_term = div_term[: d_model // 2] if d_model % 2 else div_term
    pe = pe.at[:, 1::2].set(jnp.cos(position * cos_term))
    return pe.astype(dtype)


def _tpu_limits():
    """(physical VMEM bytes, TensorCore count) with conservative fallbacks."""
    vmem = 64 * 1024 * 1024          # v7x has the smallest physical VMEM per core
    cores = 1
    try:
        info = pltpu.get_tpu_info()
        vmem = int(getattr(info, "vmem_capacity_bytes", vmem) or vmem)
        for name in ("num_cores", "num_tensorcores", "tensorcores_per_chip", "core_count"):
            val = getattr(info, name, None)
            if val:
                cores = int(val)
                break
    except Exception:
        pass
    return vmem, cores


def _patch_embed_kernel(x_ref, w_ref, pe_ref, o_ref, *, L, padding, patch_len,
                        stride, num_patches, matmul_dtype):
    # x_ref : (tb, L)            original (un-padded) series rows, lane-dense
    # w_ref : (patch_len, d_pad) transposed Linear weight (zero-padded lanes)
    # pe_ref: (P, d_pad)         positional embedding, f32
    # o_ref : (tb, P, d_pad)
    xv = x_ref[...]                                                    # (tb, L)
    if padding > 0:
        # ReplicationPad1d((0, padding)) done in VMEM: replicate the last column.
        rep = jnp.broadcast_to(xv[:, L - 1:L], (xv.shape[0], padding))
        xv = jnp.concatenate([xv, rep], axis=1)                        # (tb, L + padding)
    xv = xv.astype(matmul_dtype)
    wv = w_ref[...]                                                    # (patch_len, d_pad)
    # Static unrolled unfold: each patch window is a contiguous lane slice.
    # TODO(synk): for very large P this unroll should become a fori_loop / extra grid axis.
    for p in range(num_patches):
        seg = xv[:, p * stride: p * stride + patch_len]                # (tb, patch_len)
        y = jnp.dot(seg, wv, preferred_element_type=jnp.float32)       # MXU, f32 acc
        o_ref[:, p, :] = (y + pe_ref[p: p + 1, :]).astype(o_ref.dtype)


def patch_embedding(x, weight, *, patch_len, stride, padding,
                    matmul_dtype=jnp.float32, out_dtype=None):
    """
    x      : (B, n_vars, L)
    weight : (d_model, patch_len)  -- same layout as torch.nn.Linear.weight
    returns: ((B*n_vars, P, d_model), n_vars)

    matmul_dtype: dtype fed to the MXU (accumulation always f32). float32 gives
    parity with the PyTorch module; bf16 halves input VMEM/read traffic.
    out_dtype: output dtype (default x.dtype); pass jnp.bfloat16 to halve the
    dominant HBM write when the consumer accepts it.
    """
    B, n_vars, L = x.shape
    d_model = weight.shape[0]
    out_dtype = x.dtype if out_dtype is None else out_dtype

    BN = B * n_vars
    Lp = L + padding
    P = (Lp - patch_len) // stride + 1
    assert P >= 1, "sequence too short for one patch"

    # ---- lane-dense parameters: pad d_model up to a multiple of 128 ----
    d_pad = _round_up(d_model, 128)
    w = weight.T.astype(matmul_dtype)                                  # (patch_len, d_model)
    if d_pad != d_model:
        w = jnp.concatenate([w, jnp.zeros((patch_len, d_pad - d_model), w.dtype)], axis=1)
    pe = _positional_embedding(P, d_model)                             # (P, d_model) f32
    if d_pad != d_model:
        pe = jnp.concatenate([pe, jnp.zeros((P, d_pad - d_model), pe.dtype)], axis=1)

    xr = x.reshape(BN, L)                                              # free (merge leading dims)

    # ---- generation-aware tiling ----
    vmem_phys, num_cores = _tpu_limits()
    x_bytes = jnp.dtype(x.dtype).itemsize
    mm_bytes = jnp.dtype(matmul_dtype).itemsize
    out_bytes = jnp.dtype(out_dtype).itemsize
    P_sub = _round_up(P, 8)
    L_lane = _round_up(L, 128)
    Lp_lane = _round_up(Lp, 128)

    def footprint(tb):
        x_blk = tb * L_lane * x_bytes
        w_blk = _round_up(patch_len, 8) * d_pad * mm_bytes
        pe_blk = P_sub * d_pad * 4
        out_blk = tb * P_sub * d_pad * out_bytes
        # in-kernel temporaries: padded/cast input copy + one f32 matmul result
        tmp = tb * Lp_lane * (x_bytes + mm_bytes) + tb * d_pad * 4
        return 2 * (x_blk + w_blk + pe_blk + out_blk) + tmp            # double-buffered blocks

    budget = max(8 * 1024 * 1024, int(vmem_phys * 0.4))

    unit = 8 if BN >= 8 else BN          # sublane unit (block == full dim is exempt when BN < 8)
    target_rows = 1024                   # ~512-1024 output rows per grid step (mem-bound roofline)
    max_tb = unit * (-(-BN // unit))
    tb = min(max_tb, unit * max(1, -(-target_rows // (P * unit))))
    while tb > unit and footprint(tb) > budget:
        tb -= unit
    # TODO(synk): if even tb == unit exceeds the VMEM budget (huge P * d_model), the P
    # axis would additionally need to be split across the grid (not needed here).

    # Megacore balance: prefer a step count that is a multiple of the core count,
    # without dropping below ~256 output rows per step.
    if num_cores > 1:
        t = tb
        while t >= unit:
            gm = -(-BN // t)
            if gm >= num_cores and gm % num_cores == 0:
                tb = t
                break
            if t - unit < unit or (t - unit) * P < 256:
                break
            t -= unit

    grid_m = -(-BN // tb)
    BN_pad = grid_m * tb
    if BN_pad > BN:
        # TODO(synk): padded rows produce garbage that is sliced off below; a masked
        # store would avoid this small input copy when BN is not a multiple of tb.
        xr = jnp.concatenate([xr, jnp.zeros((BN_pad - BN, L), xr.dtype)], axis=0)

    kernel = functools.partial(
        _patch_embed_kernel, L=L, padding=padding, patch_len=patch_len,
        stride=stride, num_patches=P, matmul_dtype=matmul_dtype)

    cost = pl.CostEstimate(
        flops=2 * BN_pad * P * patch_len * d_pad,
        transcendentals=0,
        bytes_accessed=(BN_pad * L * x_bytes + patch_len * d_pad * mm_bytes
                        + P * d_pad * 4 + BN_pad * P * d_pad * out_bytes),
    )

    vmem_limit = int(min(vmem_phys - 4 * 1024 * 1024,
                         max(32 * 1024 * 1024, 2 * footprint(tb))))

    out3 = pl.pallas_call(
        kernel,
        out_shape=jax.ShapeDtypeStruct((BN_pad, P, d_pad), out_dtype),
        grid=(grid_m,),
        in_specs=[
            pl.BlockSpec((tb, L), lambda i: (i, 0)),
            pl.BlockSpec((patch_len, d_pad), lambda i: (0, 0)),   # constant -> fetched once
            pl.BlockSpec((P, d_pad), lambda i: (0, 0)),           # constant -> fetched once
        ],
        out_specs=pl.BlockSpec((tb, P, d_pad), lambda i: (i, 0, 0)),
        compiler_params=pltpu.CompilerParams(
            dimension_semantics=("parallel",),
            vmem_limit_bytes=vmem_limit,
        ),
        cost_estimate=cost,
    )(xr, w, pe)

    out = out3[:BN, :, :d_model]
    # TODO(synk): dropout is identity here (eval-mode semantics); train-mode dropout not implemented.
    return out, n_vars


if __name__ == "__main__":
    # Small, deterministic example consistent with the module.
    B, n_vars, L = 2, 4, 16
    d_model, patch_len, stride, padding = 32, 8, 4, 4

    key = jax.random.PRNGKey(0)
    kx, kw = jax.random.split(key)
    x = jax.random.normal(kx, (B, n_vars, L), dtype=jnp.float32)
    # nn.Linear default init: U(-1/sqrt(in_features), 1/sqrt(in_features))
    bound = 1.0 / math.sqrt(patch_len)
    weight = jax.random.uniform(kw, (d_model, patch_len), dtype=jnp.float32,
                                minval=-bound, maxval=bound)

    out, nv = patch_embedding(x, weight, patch_len=patch_len, stride=stride,
                              padding=padding)
    out = jax.block_until_ready(out)

    # Shape check: (B*n_vars, P, d_model)
    P = (L + padding - patch_len) // stride + 1
    assert out.shape == (B * n_vars, P, d_model), out.shape
    assert nv == n_vars

    # Numerical self-check against a plain-JAX f32 reference, validating the
    # in-kernel replication pad, unfold, matmul and PE row alignment.
    xp = jnp.concatenate([x, jnp.repeat(x[:, :, -1:], padding, axis=-1)], axis=-1)
    idx = jnp.arange(P)[:, None] * stride + jnp.arange(patch_len)[None, :]
    ref_patches = xp[:, :, idx].reshape(B * n_vars, P, patch_len)
    ref = jnp.einsum("npk,dk->npd", ref_patches, weight,
                     precision=jax.lax.Precision.HIGHEST) \
          + _positional_embedding(P, d_model)[None]
    max_err = float(jnp.max(jnp.abs(out.astype(jnp.float32) - ref)))
    assert max_err < 1e-3, f"numerical mismatch: {max_err}"

    print("KERNEL_OK")
</pallas_src>

<mosaic_0001>
module attributes {stable_mosaic.version = 11 : i64} {
  func.func @_patch_embed_kernel(%arg0: i32, %arg1: memref<8x16xf32, #tpu.memory_space<vmem>>, %arg2: memref<8x128xf32, #tpu.memory_space<vmem>>, %arg3: memref<4x128xf32, #tpu.memory_space<vmem>>, %arg4: memref<8x4x128xf32, #tpu.memory_space<vmem>>) attributes {dimension_semantics = [#tpu.dimension_semantics<parallel>], iteration_bounds = array<i64: 1>, scalar_prefetch = 0 : i64, scratch_operands = 0 : i64, tpu.core_type = #tpu.core_type<tc>, window_params = [{transform_indices = @transform_0, window_bounds = array<i64: 8, 16>}, {pipeline_mode = #tpu.pipeline_mode<synchronous>, transform_indices = @transform_1, window_bounds = array<i64: 8, 128>}, {pipeline_mode = #tpu.pipeline_mode<synchronous>, transform_indices = @transform_2, window_bounds = array<i64: 4, 128>}, {transform_indices = @transform_3, window_bounds = array<i64: 8, 4, 128>}]} {
    %c0 = arith.constant 0 : index
    %c0_0 = arith.constant 0 : index
    %0 = vector.load %arg1[%c0, %c0_0] : memref<8x16xf32, #tpu.memory_space<vmem>>, vector<8x16xf32>
    %1 = vector.extract_strided_slice %0 {offsets = [0, 15], sizes = [8, 1], strides = [1, 1]} : vector<8x16xf32> to vector<8x1xf32>
    %2 = vector.shape_cast %1 : vector<8x1xf32> to vector<8x1xf32>
    %3 = vector.broadcast %2 : vector<8x1xf32> to vector<8x4xf32>
    %4 = tpu.concatenate %0, %3 in 1 : vector<8x16xf32>, vector<8x4xf32> -> vector<8x20xf32>
    %c0_1 = arith.constant 0 : index
    %c0_2 = arith.constant 0 : index
    %5 = vector.load %arg2[%c0_1, %c0_2] : memref<8x128xf32, #tpu.memory_space<vmem>>, vector<8x128xf32>
    %6 = vector.extract_strided_slice %4 {offsets = [0, 0], sizes = [8, 8], strides = [1, 1]} : vector<8x20xf32> to vector<8x8xf32>
    %cst = arith.constant dense<0.000000e+00> : vector<8x128xf32>
    %7 = tpu.matmul %6, %5, %cst {dimension_numbers = #tpu.dot_dimension_numbers<[1], [0], [0], [1], [0, 0, 1, 1], [], []>} : vector<8x8xf32>, vector<8x128xf32>, vector<8x128xf32> -> vector<8x128xf32>
    %c0_3 = arith.constant 0 : index
    %c0_4 = arith.constant 0 : index
    %8 = vector.load %arg3[%c0_3, %c0_4] : memref<4x128xf32, #tpu.memory_space<vmem>>, vector<1x128xf32>
    %9 = vector.broadcast %8 : vector<1x128xf32> to vector<8x128xf32>
    %10 = arith.addf %7, %9 : vector<8x128xf32>
    %c0_5 = arith.constant 0 : index
    %c0_6 = arith.constant 0 : index
    %c0_7 = arith.constant 0 : index
    %11 = vector.load %arg4[%c0_5, %c0_6, %c0_7] : memref<8x4x128xf32, #tpu.memory_space<vmem>>, vector<8x1x128xf32>
    %12 = vector.shape_cast %11 : vector<8x1x128xf32> to vector<8x128xf32>
    %13 = vector.shape_cast %10 : vector<8x128xf32> to vector<8x1x128xf32>
    tpu.vector_store %arg4[%c0_5, %c0_6, %c0_7], %13 {strides = array<i32>} : memref<8x4x128xf32, #tpu.memory_space<vmem>>, vector<8x1x128xf32>,
    %14 = vector.extract_strided_slice %4 {offsets = [0, 4], sizes = [8, 8], strides = [1, 1]} : vector<8x20xf32> to vector<8x8xf32>
    %cst_8 = arith.constant dense<0.000000e+00> : vector<8x128xf32>
    %15 = tpu.matmul %14, %5, %cst_8 {dimension_numbers = #tpu.dot_dimension_numbers<[1], [0], [0], [1], [0, 0, 1, 1], [], []>} : vector<8x8xf32>, vector<8x128xf32>, vector<8x128xf32> -> vector<8x128xf32>
    %c1 = arith.constant 1 : index
    %c0_9 = arith.constant 0 : index
    %16 = vector.load %arg3[%c1, %c0_9] : memref<4x128xf32, #tpu.memory_space<vmem>>, vector<1x128xf32>
    %17 = vector.broadcast %16 : vector<1x128xf32> to vector<8x128xf32>
    %18 = arith.addf %15, %17 : vector<8x128xf32>
    %c0_10 = arith.constant 0 : index
    %c1_11 = arith.constant 1 : index
    %c0_12 = arith.constant 0 : index
    %19 = vector.load %arg4[%c0_10, %c1_11, %c0_12] : memref<8x4x128xf32, #tpu.memory_space<vmem>>, vector<8x1x128xf32>
    %20 = vector.shape_cast %19 : vector<8x1x128xf32> to vector<8x128xf32>
    %21 = vector.shape_cast %18 : vector<8x128xf32> to vector<8x1x128xf32>
    tpu.vector_store %arg4[%c0_10, %c1_11, %c0_12], %21 {strides = array<i32>} : memref<8x4x128xf32, #tpu.memory_space<vmem>>, vector<8x1x128xf32>,
    %22 = vector.extract_strided_slice %4 {offsets = [0, 8], sizes = [8, 8], strides = [1, 1]} : vector<8x20xf32> to vector<8x8xf32>
    %cst_13 = arith.constant dense<0.000000e+00> : vector<8x128xf32>
    %23 = tpu.matmul %22, %5, %cst_13 {dimension_numbers = #tpu.dot_dimension_numbers<[1], [0], [0], [1], [0, 0, 1, 1], [], []>} : vector<8x8xf32>, vector<8x128xf32>, vector<8x128xf32> -> vector<8x128xf32>
    %c2 = arith.constant 2 : index
    %c0_14 = arith.constant 0 : index
    %24 = vector.load %arg3[%c2, %c0_14] : memref<4x128xf32, #tpu.memory_space<vmem>>, vector<1x128xf32>
    %25 = vector.broadcast %24 : vector<1x128xf32> to vector<8x128xf32>
    %26 = arith.addf %23, %25 : vector<8x128xf32>
    %c0_15 = arith.constant 0 : index
    %c2_16 = arith.constant 2 : index
    %c0_17 = arith.constant 0 : index
    %27 = vector.load %arg4[%c0_15, %c2_16, %c0_17] : memref<8x4x128xf32, #tpu.memory_space<vmem>>, vector<8x1x128xf32>
    %28 = vector.shape_cast %27 : vector<8x1x128xf32> to vector<8x128xf32>
    %29 = vector.shape_cast %26 : vector<8x128xf32> to vector<8x1x128xf32>
    tpu.vector_store %arg4[%c0_15, %c2_16, %c0_17], %29 {strides = array<i32>} : memref<8x4x128xf32, #tpu.memory_space<vmem>>, vector<8x1x128xf32>,
    %30 = vector.extract_strided_slice %4 {offsets = [0, 12], sizes = [8, 8], strides = [1, 1]} : vector<8x20xf32> to vector<8x8xf32>
    %cst_18 = arith.constant dense<0.000000e+00> : vector<8x128xf32>
    %31 = tpu.matmul %30, %5, %cst_18 {dimension_numbers = #tpu.dot_dimension_numbers<[1], [0], [0], [1], [0, 0, 1, 1], [], []>} : vector<8x8xf32>, vector<8x128xf32>, vector<8x128xf32> -> vector<8x128xf32>
    %c3 = arith.constant 3 : index
    %c0_19 = arith.constant 0 : index
    %32 = vector.load %arg3[%c3, %c0_19] : memref<4x128xf32, #tpu.memory_space<vmem>>, vector<1x128xf32>
    %33 = vector.broadcast %32 : vector<1x128xf32> to vector<8x128xf32>
    %34 = arith.addf %31, %33 : vector<8x128xf32>
    %c0_20 = arith.constant 0 : index
    %c3_21 = arith.constant 3 : index
    %c0_22 = arith.constant 0 : index
    %35 = vector.load %arg4[%c0_20, %c3_21, %c0_22] : memref<8x4x128xf32, #tpu.memory_space<vmem>>, vector<8x1x128xf32>
    %36 = vector.shape_cast %35 : vector<8x1x128xf32> to vector<8x128xf32>
    %37 = vector.shape_cast %34 : vector<8x128xf32> to vector<8x1x128xf32>
    tpu.vector_store %arg4[%c0_20, %c3_21, %c0_22], %37 {strides = array<i32>} : memref<8x4x128xf32, #tpu.memory_space<vmem>>, vector<8x1x128xf32>,
    return
  }
  func.func @transform_0(%arg0: i32) -> (i32, i32) {
    %c0_i32 = arith.constant 0 : i32
    %c0_i32_0 = arith.constant 0 : i32
    return %arg0, %c0_i32 : i32, i32
  }
  func.func @transform_1(%arg0: i32) -> (i32, i32) {
    %c0_i32 = arith.constant 0 : i32
    %c0_i32_0 = arith.constant 0 : i32
    %c0_i32_1 = arith.constant 0 : i32
    return %c0_i32, %c0_i32_0 : i32, i32
  }
  func.func @transform_2(%arg0: i32) -> (i32, i32) {
    %c0_i32 = arith.constant 0 : i32
    %c0_i32_0 = arith.constant 0 : i32
    %c0_i32_1 = arith.constant 0 : i32
    return %c0_i32, %c0_i32_0 : i32, i32
  }
  func.func @transform_3(%arg0: i32) -> (i32, i32, i32) {
    %c0_i32 = arith.constant 0 : i32
    %c0_i32_0 = arith.constant 0 : i32
    %c0_i32_1 = arith.constant 0 : i32
    return %arg0, %c0_i32, %c0_i32_0 : i32, i32, i32
  }
}

</mosaic_0001>

<bundles_post_ra>
// kernel: tpu_custom_call.1
= control target key start
LH: loop header
LB: loop body
LE: loop exit
PB: predicated region body
PF: predicated region fallthrough
CT: control target
= control target key end

     0   :  { %8 = vsyncpa [#allocation3], 0  ;;  %s897_s0 = inlined_call_operand.hbm [shape: f32[8,16], index: 0, kind: input, shape index: {}]   ;;  %s898_s1 = inlined_call_operand.hbm [shape: f32[8,128], index: 1, kind: input, shape index: {}]   ;;  %s899_s2 = inlined_call_operand.vmem [shape: f32[4,128], index: 2, kind: input, shape index: {}]   ;;  %s900_s3 = inlined_call_operand.hbm [shape: f32[8,4,128], index: 3, kind: output, shape index: {}]  }
   0x1   :  { %9 = vsyncpa [#allocation6], 0 }
   0x2   :  { %10 = vsyncpa [#allocation4], 0  ;;  %s783_s12 = smov [#allocation2]   ;;  %s784_s14 = smov [#allocation5]  }
   0x3   :  { %s17_s13 = sshll.u32 %s783_s12, 4  ;;  %s27_s15 = sshll.u32 %s784_s14, 4  ;;  %s18_s13 = int_to_ptr.vmem [resolvable:$true] %s17_s13  ;;  %s28_s15 = int_to_ptr.vmem [resolvable:$true] %s27_s15 }
   0x4   :  { %s711_s18 = scalar_lea.hbm %s897_s0, 128 }
   0x5   :  { %p712_p0 = scmp.ne.s32.totalorder %s897_s0, %s711_s18  ;;  %p715_p1 = scmp.lt.u32.totalorder %s711_s18, %s897_s0 }
   0x7   :  { %p717_p2 = pnand %p715_p1, %p712_p0 }
   0x9   :  { %720 = shalt.err (!%p717_p2)
}
   0xa   :  { %s721_s23 = scalar_lea.vmem %s18_s13, 128  ;;  %p726_p4 = scmp.lt.s32.totalorder %s18_s13, %s18_s13 }
   0xb   :  { %p722_p3 = scmp.ne.s32.totalorder %s18_s13, %s721_s23  ;;  %p727_p5 = scmp.lt.s32.totalorder %s721_s23, %s721_s23 }
   0xd   :  { %p728_p6 = por %p727_p5, %p726_p4 }
   0xf   :  { %p729_p7 = pnand %p728_p6, %p722_p3 }
  0x11   :  { %732 = shalt.err (!%p729_p7)
}
  0x12   :  { %20 = dma.hbm_to_vmem [thread:$0]  %s897_s0, 128, %s18_s13, [#allocation3]  }
  0x13   :  { %s733_s28 = scalar_lea.hbm %s898_s1, 128 }
  0x14   :  { %p734_p8 = scmp.ne.s32.totalorder %s898_s1, %s733_s28  ;;  %p737_p9 = scmp.lt.u32.totalorder %s733_s28, %s898_s1 }
  0x16   :  { %p739_p10 = pnand %p737_p9, %p734_p8 }
  0x18   :  { %742 = shalt.err (!%p739_p10)
}
  0x19   :  { %s743_s6 = scalar_lea.vmem %s28_s15, 128  ;;  %p748_p12 = scmp.lt.s32.totalorder %s28_s15, %s28_s15 }
  0x1a   :  { %p744_p11 = scmp.ne.s32.totalorder %s28_s15, %s743_s6  ;;  %p749_p13 = scmp.lt.s32.totalorder %s743_s6, %s743_s6 }
  0x1c   :  { %p750_p0 = por %p749_p13, %p748_p12 }
  0x1e   :  { %p751_p1 = pnand %p750_p0, %p744_p11 }
  0x20   :  { %754 = shalt.err (!%p751_p1)
}
  0x21   :  { %30 = dma.hbm_to_vmem [thread:$0]  %s898_s1, 128, %s28_s15, [#allocation6]  }
  0x22   :  { %777 = dma.done.wait [#allocation3], 128  }
  0x23   :  { %778 = vsyncadd [#allocation3], 4294967168 }
  0x24   :  { %779 = dma.done.wait [#allocation6], 128  }
  0x25   :  { %780 = vsyncadd [#allocation6], 4294967168  ;;  %v785_v0 = vmov 15   ;;  %v786_v1 = vmov 0.0   ;;  %v39_v2 = vld [vmem:[#allocation2] sm:$0xff]  ;;  %v47_v3 = vld [vmem:[#allocation5] sm:$0xff]  ;;  %v132_v11 = vlaneseq }
  0x26   :  { %710 = vset.pattern.permute.xlu0 %v785_v0  ;;  %678 = vmatprep.subr.mxu0 %v786_v1  ;;  %vm787_vm0 = vmmov 0   ;;  %vm45_vm1 = vcmask 130048   ;;  %vm53_vm2 = vcmask 64512   ;;  %s788_s1 = smov 120   ;;  %s789_s8 = smov 124  }
  0x27   :  { %683 = vmatprep.subr.mxu1 %v786_v1  ;;  %42 = vperm.xlu0 %710, %v39_v2   ;;  %s790_s9 = smov 116   ;;  %v791_v9 = vmov 1966171168   ;;  %v133_v13 = vshrl.u32 %v132_v11, 7  ;;  %v646_v14 = vld [vmem:[%s899_s2] ss:$0 sm:$0xff] }
  0x28   :  { %679 = vmatpush3.msra.mxu0 %v47_v3  ;;  %680 = vmatprep.mubr.msk.f32.mxu0 %vm787_vm0, %v786_v1  ;;  %v130_v10 = vunpack.c.l.s4 %v791_v9  ;;  %v652_v32 = vld [vmem:[%s899_s2 + $0x1] ss:$0 sm:$0xff]  ;;  %v658_v33 = vld [vmem:[%s899_s2 + $0x2] ss:$0 sm:$0xff]  ;;  %v664_v44 = vld [vmem:[%s899_s2 + $0x3] ss:$0 sm:$0xff] }
  0x29   :  { %684 = vmatpush3.msra.mxu1 %v47_v3  ;;  %688 = vmatprep.subr.mxu0 %v786_v1  ;;  %s792_s2 = smov [#allocation7]  }
  0x2a   :  { %685 = vmatprep.mubr.msk.f32.mxu1 %vm787_vm0, %v786_v1  ;;  %693 = vmatprep.subr.mxu1 %v786_v1  ;;  %v131_v12 = vunpack.c.0.s8 %v130_v10  ;;  %s633_s18 = sshll.u32 %s792_s2, 4  ;;  %s634_s18 = int_to_ptr.vmem [resolvable:$true] %s633_s18 }
  0x2b   :  { %s755_s19 = scalar_lea.vmem %s634_s18, 512  ;;  %p760_p3 = scmp.lt.s32.totalorder %s634_s18, %s634_s18 }
  0x2c   :  { %v850_v15 = vsub.s32 %v131_v12, %v133_v13  ;;  %p756_p2 = scmp.ne.s32.totalorder %s634_s18, %s755_s19  ;;  %p761_p4 = scmp.lt.s32.totalorder %s755_s19, %s755_s19 }
  0x2e   :  { %p762_p5 = por %p761_p4, %p760_p3 }
  0x30   :  { %p763_p6 = pnand %p762_p5, %p756_p2 }
  0xa6   :  { %v43_v4 = vpop.permute.xlu0 %42 }
  0xa7   :  { %v46_v5 = vsel %vm45_vm1, %v39_v2, %v43_v4 }
  0xa8   :  { %343 = vrot.lane.b32.xlu1 %v46_v5, %s788_s1  ;;  %198 = vrot.lane.b32.xlu0 %v46_v5, %s789_s8 }
  0xa9   :  { %681 = vmatmul.mubr.msk.f32.vlgmr.msra.gmra.mrb[0].mxu0 %vm53_vm2, %v46_v5 }
  0xaa   :  { %689 = vmatpush3.msra.mxu0 %v47_v3  ;;  %690 = vmatprep.mubr.msk.f32.mxu0 %vm787_vm0, %v786_v1 }
  0xac   :  { %488 = vrot.lane.b32.xlu1 %v46_v5, %s790_s9 }
 0x11a   :  { %v344_v6 = vpop.permute.xlu1 %343  ;;  %v199_v7 = vpop.permute.xlu0 %198 }
 0x11b   :  { %686 = vmatmul.mubr.msk.f32.vlgmr.msra.gmra.mrb[0].mxu1 %vm53_vm2, %v199_v7  ;;  %691 = vmatmul.mubr.msk.f32.vlgmr.msra.gmra.mrb[2].mxu0 %vm53_vm2, %v344_v6 }
 0x11c   :  { %694 = vmatpush3.msra.mxu1 %v47_v3  ;;  %695 = vmatprep.mubr.msk.f32.mxu1 %vm787_vm0, %v786_v1 }
 0x11e   :  { %v489_v8 = vpop.permute.xlu1 %488 }
 0x11f   :  { %696 = vmatmul.mubr.msk.f32.vlgmr.msra.gmra.mrb[2].mxu1 %vm53_vm2, %v489_v8 }
 0x17c   :  { %v123_v16 = vpop.f32.mrb[0].mxu0 }
 0x17d   :  { %v124_v17 = vadd.f32 %v646_v14, %v123_v16  ;;  %v682_v18 = vpop.f32.mrb[1].mxu0 }
 0x17f   :  { %v128_v19 = vcombine.high %v124_v17, %v124_v17  ;;  %v135_v20 = vrot.slane %v124_v17, %v850_v15 }
 0x181   :  { %v142_v21 = vrot.slane %v128_v19, %v850_v15  ;;  %v143_v22 = vcombine.high %v135_v20, %v135_v20  ;;  %v151_v23 = vrot.slane %v135_v20, %v850_v15  ;;  %648 = vst.sshfl [vmem:[#allocation7] sm:$0x1 pattern:$0x73625140] %v135_v20 }
 0x183   :  { %v144_v24 = vcombine.high %v142_v21, %v142_v21  ;;  %v158_v25 = vrot.slane %v142_v21, %v850_v15  ;;  %v165_v26 = vrot.slane %v143_v22, %v850_v15  ;;  %v173_v27 = vcombine.high %v151_v23, %v151_v23  ;;  %649 = vst.sshfl [vmem:[#allocation7 + $0x4] sm:$0x1 pattern:$0x73625140] %v143_v22 }
 0x184   :  { %650 = vst.sshfl [vmem:[#allocation7 + $0x10] sm:$0x1 pattern:$0x73625140] %v142_v21 }
 0x185   :  { %v172_v28 = vrot.slane %v144_v24, %v850_v15  ;;  %v174_v29 = vcombine.high %v158_v25, %v158_v25  ;;  %v175_v30 = vcombine.high %v165_v26, %v165_v26  ;;  %187 = vst [vmem:[#allocation7 + $0x8] sm:$0x1] %v173_v27  ;;  %651 = vst.sshfl [vmem:[#allocation7 + $0x14] sm:$0x1 pattern:$0x73625140] %v144_v24 }
 0x187   :  { %v176_v31 = vcombine.high %v172_v28, %v172_v28  ;;  %188 = vst [vmem:[#allocation7 + $0xc] sm:$0x1] %v175_v30  ;;  %191 = vst [vmem:[#allocation7 + $0x18] sm:$0x1] %v174_v29 }
 0x189   :  { %192 = vst [vmem:[#allocation7 + $0x1c] sm:$0x1] %v176_v31 }
 0x1ee   :  { %v268_v34 = vpop.f32.mrb[0].mxu1  ;;  %v413_v35 = vpop.f32.mrb[2].mxu0 }
 0x1ef   :  { %v269_v36 = vadd.f32 %v652_v32, %v268_v34  ;;  %v414_v37 = vadd.f32 %v658_v33, %v413_v35  ;;  %v687_v38 = vpop.f32.mrb[1].mxu1  ;;  %v692_v39 = vpop.f32.mrb[3].mxu0 }
 0x1f1   :  { %v273_v40 = vcombine.high %v269_v36, %v269_v36  ;;  %v280_v41 = vrot.slane %v269_v36, %v850_v15  ;;  %v418_v42 = vcombine.high %v414_v37, %v414_v37  ;;  %v425_v43 = vrot.slane %v414_v37, %v850_v15 }
 0x1f2   :  { %v558_v45 = vpop.f32.mrb[2].mxu1 }
 0x1f3   :  { %v287_v46 = vrot.slane %v273_v40, %v850_v15  ;;  %v288_v47 = vcombine.high %v280_v41, %v280_v41  ;;  %v296_v48 = vrot.slane %v280_v41, %v850_v15  ;;  %654 = vst.sshfl [vmem:[#allocation7 + $0x1] sm:$0x1 pattern:$0x73625140] %v280_v41  ;;  %v432_v49 = vrot.slane %v418_v42, %v850_v15  ;;  %v697_v50 = vpop.f32.mrb[3].mxu1 }
 0x1f4   :  { %660 = vst.sshfl [vmem:[#allocation7 + $0x2] sm:$0x1 pattern:$0x73625140] %v425_v43  ;;  %v433_v51 = vcombine.high %v425_v43, %v425_v43  ;;  %v441_v52 = vrot.slane %v425_v43, %v850_v15  ;;  %v559_v53 = vadd.f32 %v664_v44, %v558_v45 }
 0x1f5   :  { %v289_v54 = vcombine.high %v287_v46, %v287_v46  ;;  %v303_v55 = vrot.slane %v287_v46, %v850_v15  ;;  %v310_v56 = vrot.slane %v288_v47, %v850_v15  ;;  %v318_v57 = vcombine.high %v296_v48, %v296_v48  ;;  %655 = vst.sshfl [vmem:[#allocation7 + $0x5] sm:$0x1 pattern:$0x73625140] %v288_v47 }
 0x1f6   :  { %656 = vst.sshfl [vmem:[#allocation7 + $0x11] sm:$0x1 pattern:$0x73625140] %v287_v46  ;;  %v434_v58 = vcombine.high %v432_v49, %v432_v49  ;;  %v448_v59 = vrot.slane %v432_v49, %v850_v15  ;;  %v455_v60 = vrot.slane %v433_v51, %v850_v15  ;;  %v463_v61 = vcombine.high %v441_v52, %v441_v52 }
 0x1f7   :  { %662 = vst.sshfl [vmem:[#allocation7 + $0x12] sm:$0x1 pattern:$0x73625140] %v432_v49  ;;  %v317_v62 = vrot.slane %v289_v54, %v850_v15  ;;  %v319_v63 = vcombine.high %v303_v55, %v303_v55  ;;  %v320_v0 = vcombine.high %v310_v56, %v310_v56  ;;  %332 = vst [vmem:[#allocation7 + $0x9] sm:$0x1] %v318_v57 }
 0x1f8   :  { %661 = vst.sshfl [vmem:[#allocation7 + $0x6] sm:$0x1 pattern:$0x73625140] %v433_v51  ;;  %v563_v1 = vcombine.high %v559_v53, %v559_v53  ;;  %v462_v2 = vrot.slane %v434_v58, %v850_v15  ;;  %v464_v3 = vcombine.high %v448_v59, %v448_v59  ;;  %v465_v4 = vcombine.high %v455_v60, %v455_v60 }
 0x1f9   :  { %657 = vst.sshfl [vmem:[#allocation7 + $0x15] sm:$0x1 pattern:$0x73625140] %v289_v54  ;;  %477 = vst [vmem:[#allocation7 + $0xa] sm:$0x1] %v463_v61  ;;  %v570_v5 = vrot.slane %v559_v53, %v850_v15  ;;  %v321_v6 = vcombine.high %v317_v62, %v317_v62 }
 0x1fa   :  { %663 = vst.sshfl [vmem:[#allocation7 + $0x16] sm:$0x1 pattern:$0x73625140] %v434_v58  ;;  %333 = vst [vmem:[#allocation7 + $0xd] sm:$0x1] %v320_v0  ;;  %v577_v7 = vrot.slane %v563_v1, %v850_v15  ;;  %v466_v8 = vcombine.high %v462_v2, %v462_v2 }
 0x1fb   :  { %336 = vst [vmem:[#allocation7 + $0x19] sm:$0x1] %v319_v63  ;;  %478 = vst [vmem:[#allocation7 + $0xe] sm:$0x1] %v465_v4  ;;  %v578_v9 = vcombine.high %v570_v5, %v570_v5  ;;  %v586_v10 = vrot.slane %v570_v5, %v850_v15 }
 0x1fc   :  { %481 = vst [vmem:[#allocation7 + $0x1a] sm:$0x1] %v464_v3  ;;  %666 = vst.sshfl [vmem:[#allocation7 + $0x3] sm:$0x1 pattern:$0x73625140] %v570_v5  ;;  %v579_v11 = vcombine.high %v577_v7, %v577_v7  ;;  %v593_v12 = vrot.slane %v577_v7, %v850_v15 }
 0x1fd   :  { %337 = vst [vmem:[#allocation7 + $0x1d] sm:$0x1] %v321_v6  ;;  %668 = vst.sshfl [vmem:[#allocation7 + $0x13] sm:$0x1 pattern:$0x73625140] %v577_v7  ;;  %v600_v13 = vrot.slane %v578_v9, %v850_v15  ;;  %v608_v14 = vcombine.high %v586_v10, %v586_v10 }
 0x1fe   :  { %482 = vst [vmem:[#allocation7 + $0x1e] sm:$0x1] %v466_v8  ;;  %667 = vst.sshfl [vmem:[#allocation7 + $0x7] sm:$0x1 pattern:$0x73625140] %v578_v9  ;;  %v607_v16 = vrot.slane %v579_v11, %v850_v15  ;;  %v609_v17 = vcombine.high %v593_v12, %v593_v12 }
 0x1ff   :  { %669 = vst.sshfl [vmem:[#allocation7 + $0x17] sm:$0x1 pattern:$0x73625140] %v579_v11  ;;  %v610_v18 = vcombine.high %v600_v13, %v600_v13  ;;  %622 = vst [vmem:[#allocation7 + $0xb] sm:$0x1] %v608_v14 }
 0x200   :  { %v611_v19 = vcombine.high %v607_v16, %v607_v16  ;;  %626 = vst [vmem:[#allocation7 + $0x1b] sm:$0x1] %v609_v17 }
 0x201   :  { %623 = vst [vmem:[#allocation7 + $0xf] sm:$0x1] %v610_v18 }
 0x202   :  { %627 = vst [vmem:[#allocation7 + $0x1f] sm:$0x1] %v611_v19 }
 0x203   :  { %766 = shalt.err (!%p763_p6)
}
 0x204   :  { %s767_s22 = scalar_lea.hbm %s900_s3, 512 }
 0x205   :  { %p768_p7 = scmp.ne.s32.totalorder %s900_s3, %s767_s22  ;;  %p771_p8 = scmp.lt.u32.totalorder %s767_s22, %s900_s3 }
 0x207   :  { %p773_p9 = pnand %p771_p8, %p768_p7 }
 0x209   :  { %776 = shalt.err (!%p773_p9)
}
 0x20a   :  { %s793_s27 = smov 64   ;;  %s794_s28 = smov 4  }
 0x20b   :  { %639 = dma.vmem_to_hbm [thread:$0]  %s634_s18, 512, %s900_s3, [#allocation4], %s793_s27, %s793_s27, %s794_s28  }
 0x20c   :  { %781 = dma.done.wait [#allocation4], 512  }
 0x20d   :  { %782 = vsyncadd [#allocation4], 4294966784 }
 0x20e   :  { %643 = vsyncpa [#allocation3], 1 }
 0x20f   :  { %644 = vsyncpa [#allocation6], 1 }
 0x210   :  { %645 = vsyncpa [#allocation4], 1 }

</bundles_post_ra>
